<compile_context>
chip_gen: v7x
topology: tpu7x:2x2x1
jax: 0.10.0
libtpu: 0.0.40
codegen_flags: <defaults>
</compile_context>

<pallas_src>
import math

import jax
import jax.numpy as jnp
from jax.experimental import pallas as pl
from jax.experimental.pallas import tpu as pltpu


def _round_up(n, m):
    return ((n + m - 1) // m) * m


def _vmem_capacity_bytes():
    try:
        return int(pltpu.get_tpu_info().vmem_capacity_bytes)
    except Exception:
        return 64 << 20  # conservative fallback (v7x per-core VMEM)


def _discriminator_kernel(x_ref, w1_ref, b1_ref, w2_ref, b2_ref, w3_ref, b3_ref,
                          out_ref):
    # Layer 1: MXU matmul (bf16 operands, f32 accumulate) + bias/ReLU in f32.
    h1 = jnp.dot(x_ref[...], w1_ref[...], preferred_element_type=jnp.float32)
    h1 = jnp.maximum(h1 + b1_ref[...], 0.0)
    # Layer 2: Linear + ReLU.
    h2 = jnp.dot(h1.astype(w2_ref.dtype), w2_ref[...],
                 preferred_element_type=jnp.float32)
    h2 = jnp.maximum(h2 + b2_ref[...], 0.0)
    # Layer 3: Linear (no activation).
    y = jnp.dot(h2.astype(w3_ref.dtype), w3_ref[...],
                preferred_element_type=jnp.float32)
    out_ref[...] = (y + b3_ref[...]).astype(out_ref.dtype)


def init_params(key, input_dim, hidden_dim, output_dim):
    """PyTorch nn.Linear-style init; weights stored [in, out] (transposed vs torch)."""
    keys = jax.random.split(key, 6)

    def linear(kw, kb, fan_in, fan_out):
        bound = 1.0 / math.sqrt(fan_in)
        w = jax.random.uniform(kw, (fan_in, fan_out), jnp.float32, -bound, bound)
        b = jax.random.uniform(kb, (1, fan_out), jnp.float32, -bound, bound)
        return w, b

    w1, b1 = linear(keys[0], keys[1], input_dim, hidden_dim)
    w2, b2 = linear(keys[2], keys[3], hidden_dim, hidden_dim)
    w3, b3 = linear(keys[4], keys[5], hidden_dim, output_dim)
    return {"w1": w1, "b1": b1, "w2": w2, "b2": b2, "w3": w3, "b3": b3}


def prepare_params(params):
    """One-time prep: zero-pad feature dims to 128-lane multiples, cast weights to
    bf16 (biases stay f32). Do this once at init and reuse on every forward call
    — keeps the per-call wrapper free of weight HBM traffic."""
    w1, b1 = params["w1"], params["b1"]
    w2, b2 = params["w2"], params["b2"]
    w3, b3 = params["w3"], params["b3"]
    in_dim, hidden_dim = w1.shape
    out_dim = w3.shape[1]
    in_p, hid_p, out_p = (_round_up(d, 128) for d in (in_dim, hidden_dim, out_dim))

    def pad_w(w, rows, cols):
        return jnp.pad(w.astype(jnp.bfloat16),
                       ((0, rows - w.shape[0]), (0, cols - w.shape[1])))

    def pad_b(b, cols):
        return jnp.pad(b.astype(jnp.float32), ((0, 0), (0, cols - b.shape[1])))

    return {
        "w1": pad_w(w1, in_p, hid_p), "b1": pad_b(b1, hid_p),
        "w2": pad_w(w2, hid_p, hid_p), "b2": pad_b(b2, hid_p),
        "w3": pad_w(w3, hid_p, out_p), "b3": pad_b(b3, out_p),
        "dims": (in_dim, hidden_dim, out_dim),
        "padded_dims": (in_p, hid_p, out_p),
    }


def _const_spec(shape):
    """VMEM-resident constant operand (same block every grid step); single-buffered
    when the installed jax supports pipeline_mode=pl.Buffered."""
    index_map = lambda i: (0, 0)
    if hasattr(pl, "Buffered"):
        try:
            return pl.BlockSpec(shape, index_map, pipeline_mode=pl.Buffered(1))
        except TypeError:
            pass
    return pl.BlockSpec(shape, index_map)


def discriminator_forward(x, prepared, *, block_batch=None):
    """x: [B, input_dim] float32. prepared: output of prepare_params()."""
    in_dim, hidden_dim, out_dim = prepared["dims"]
    in_p, hid_p, out_p = prepared["padded_dims"]
    w1_p, b1_p = prepared["w1"], prepared["b1"]
    w2_p, b2_p = prepared["w2"], prepared["b2"]
    w3_p, b3_p = prepared["w3"], prepared["b3"]

    B = x.shape[0]
    assert x.shape[1] == in_dim

    bf16 = jnp.bfloat16
    cap = _vmem_capacity_bytes()

    # Per-generation batch tile: bigger on v5e/v6e (128 MiB VMEM), 512 on v7x.
    if block_batch is None:
        block_batch = 1024 if cap >= (96 << 20) else 512
    block_batch = _round_up(block_batch, 8)

    # Pad batch only to an 8-row sublane multiple; the ragged last grid block is
    # handled by Pallas (rows are independent; padded rows are sliced off below).
    rows = _round_up(B, 8)
    if rows <= block_batch:
        # Split into >=2 tiles when possible so ("parallel",) shards work across
        # both v7x TensorCores (no effect on single-TC v5e/v6e).
        tb = rows if rows < 16 else _round_up(pl.cdiv(rows, 2), 8)
    else:
        tb = block_batch
    grid = (pl.cdiv(rows, tb),)

    # Activation input: pass through when already aligned, else one fused pad+cast.
    if B == rows and in_dim == in_p:
        x_in = x.astype(bf16)
    else:
        x_in = jnp.pad(x.astype(bf16), ((0, rows - B), (0, in_p - in_dim)))

    grid_spec = pltpu.PrefetchScalarGridSpec(
        num_scalar_prefetch=0,
        grid=grid,
        in_specs=[
            pl.BlockSpec((tb, in_p), lambda i: (i, 0)),   # x: tiled over batch
            _const_spec((in_p, hid_p)),                   # w1
            _const_spec((1, hid_p)),                      # b1
            _const_spec((hid_p, hid_p)),                  # w2
            _const_spec((1, hid_p)),                      # b2
            _const_spec((hid_p, out_p)),                  # w3
            _const_spec((1, out_p)),                      # b3
        ],
        out_specs=pl.BlockSpec((tb, out_p), lambda i: (i, 0)),
    )

    weight_bytes = ((w1_p.size + w2_p.size + w3_p.size) * 2
                    + (b1_p.size + b2_p.size + b3_p.size) * 4)

    # Advisory cost estimate for XLA's scheduler.
    cost = pl.CostEstimate(
        flops=2 * rows * (in_p * hid_p + hid_p * hid_p + hid_p * out_p),
        transcendentals=0,
        bytes_accessed=x_in.size * 2 + weight_bytes + rows * out_p * 2)

    # VMEM budget: double-buffered x/out tiles + single-buffered resident
    # weights/biases + f32 intermediates; clamp to this generation's capacity.
    vmem_bytes = (2 * tb * in_p * 2            # x tile, bf16, double-buffered
                  + 2 * tb * out_p * 2         # out tile, bf16, double-buffered
                  + weight_bytes               # resident weights/biases (1x)
                  + 2 * tb * hid_p * 4)        # f32 h1/h2 intermediates
    vmem_limit = int(max(min(vmem_bytes + (4 << 20), cap - (8 << 20)), 32 << 20))

    out_padded = pl.pallas_call(
        _discriminator_kernel,
        out_shape=jax.ShapeDtypeStruct((rows, out_p), bf16),
        grid_spec=grid_spec,
        compiler_params=pltpu.CompilerParams(
            dimension_semantics=("parallel",),   # megacore sharding on v7x
            vmem_limit_bytes=vmem_limit),
        cost_estimate=cost,
    )(x_in, w1_p, b1_p, w2_p, b2_p, w3_p, b3_p)

    return out_padded[:B, :out_dim].astype(jnp.float32)


def reference_forward(x, p):
    h1 = jnp.maximum(x @ p["w1"] + p["b1"], 0.0)
    h2 = jnp.maximum(h1 @ p["w2"] + p["b2"], 0.0)
    return h2 @ p["w3"] + p["b3"]


if __name__ == "__main__":
    key = jax.random.PRNGKey(0)
    k_x, k_p = jax.random.split(key)

    batch = 8
    input_dim, hidden_dim, output_dim = 16, 32, 4

    x = jax.random.normal(k_x, (batch, input_dim), jnp.float32)
    params = init_params(k_p, input_dim, hidden_dim, output_dim)
    prepared = prepare_params(params)   # one-time pad + bf16 cast (cached)

    out = discriminator_forward(x, prepared)
    out = jax.block_until_ready(out)

    ref = reference_forward(x, params)
    assert out.shape == (batch, output_dim)
    # bf16 MXU operands/activations with f32 accumulation: loosened tolerance
    # vs the f32 reference.
    assert jnp.allclose(out, ref, atol=3e-2, rtol=3e-2), "mismatch vs reference"

    print("KERNEL_OK")
</pallas_src>

<mosaic_0001>
module attributes {stable_mosaic.version = 11 : i64} {
  func.func @_discriminator_kernel(%arg0: i32, %arg1: memref<8x128xbf16, #tpu.memory_space<vmem>>, %arg2: memref<128x128xbf16, #tpu.memory_space<vmem>>, %arg3: memref<1x128xf32, #tpu.memory_space<vmem>>, %arg4: memref<128x128xbf16, #tpu.memory_space<vmem>>, %arg5: memref<1x128xf32, #tpu.memory_space<vmem>>, %arg6: memref<128x128xbf16, #tpu.memory_space<vmem>>, %arg7: memref<1x128xf32, #tpu.memory_space<vmem>>, %arg8: memref<8x128xbf16, #tpu.memory_space<vmem>>) attributes {dimension_semantics = [#tpu.dimension_semantics<parallel>], iteration_bounds = array<i64: 1>, scalar_prefetch = 0 : i64, scratch_operands = 0 : i64, tpu.core_type = #tpu.core_type<tc>, window_params = [{transform_indices = @transform_0, window_bounds = array<i64: 8, 128>}, {pipeline_mode = #tpu.pipeline_mode<synchronous>, transform_indices = @transform_1, window_bounds = array<i64: 128, 128>}, {pipeline_mode = #tpu.pipeline_mode<synchronous>, transform_indices = @transform_2, window_bounds = array<i64: 1, 128>}, {pipeline_mode = #tpu.pipeline_mode<synchronous>, transform_indices = @transform_3, window_bounds = array<i64: 128, 128>}, {pipeline_mode = #tpu.pipeline_mode<synchronous>, transform_indices = @transform_4, window_bounds = array<i64: 1, 128>}, {pipeline_mode = #tpu.pipeline_mode<synchronous>, transform_indices = @transform_5, window_bounds = array<i64: 128, 128>}, {pipeline_mode = #tpu.pipeline_mode<synchronous>, transform_indices = @transform_6, window_bounds = array<i64: 1, 128>}, {transform_indices = @transform_7, window_bounds = array<i64: 8, 128>}]} {
    %c0 = arith.constant 0 : index
    %c0_0 = arith.constant 0 : index
    %0 = vector.load %arg1[%c0, %c0_0] : memref<8x128xbf16, #tpu.memory_space<vmem>>, vector<8x128xbf16>
    %c0_1 = arith.constant 0 : index
    %c0_2 = arith.constant 0 : index
    %1 = vector.load %arg2[%c0_1, %c0_2] : memref<128x128xbf16, #tpu.memory_space<vmem>>, vector<128x128xbf16>
    %cst = arith.constant dense<0.000000e+00> : vector<8x128xf32>
    %2 = tpu.matmul %0, %1, %cst {dimension_numbers = #tpu.dot_dimension_numbers<[1], [0], [0], [1], [0, 0, 1, 1], [], []>} : vector<8x128xbf16>, vector<128x128xbf16>, vector<8x128xf32> -> vector<8x128xf32>
    %c0_3 = arith.constant 0 : index
    %c0_4 = arith.constant 0 : index
    %3 = vector.load %arg3[%c0_3, %c0_4] : memref<1x128xf32, #tpu.memory_space<vmem>>, vector<1x128xf32>
    %4 = vector.broadcast %3 : vector<1x128xf32> to vector<8x128xf32>
    %5 = arith.addf %2, %4 : vector<8x128xf32>
    %cst_5 = arith.constant 0.000000e+00 : f32
    %6 = vector.broadcast %cst_5 : f32 to vector<8x128xf32>
    %7 = arith.maximumf %5, %6 : vector<8x128xf32>
    %8 = arith.truncf %7 : vector<8x128xf32> to vector<8x128xbf16>
    %c0_6 = arith.constant 0 : index
    %c0_7 = arith.constant 0 : index
    %9 = vector.load %arg4[%c0_6, %c0_7] : memref<128x128xbf16, #tpu.memory_space<vmem>>, vector<128x128xbf16>
    %cst_8 = arith.constant dense<0.000000e+00> : vector<8x128xf32>
    %10 = tpu.matmul %8, %9, %cst_8 {dimension_numbers = #tpu.dot_dimension_numbers<[1], [0], [0], [1], [0, 0, 1, 1], [], []>} : vector<8x128xbf16>, vector<128x128xbf16>, vector<8x128xf32> -> vector<8x128xf32>
    %c0_9 = arith.constant 0 : index
    %c0_10 = arith.constant 0 : index
    %11 = vector.load %arg5[%c0_9, %c0_10] : memref<1x128xf32, #tpu.memory_space<vmem>>, vector<1x128xf32>
    %12 = vector.broadcast %11 : vector<1x128xf32> to vector<8x128xf32>
    %13 = arith.addf %10, %12 : vector<8x128xf32>
    %cst_11 = arith.constant 0.000000e+00 : f32
    %14 = vector.broadcast %cst_11 : f32 to vector<8x128xf32>
    %15 = arith.maximumf %13, %14 : vector<8x128xf32>
    %16 = arith.truncf %15 : vector<8x128xf32> to vector<8x128xbf16>
    %c0_12 = arith.constant 0 : index
    %c0_13 = arith.constant 0 : index
    %17 = vector.load %arg6[%c0_12, %c0_13] : memref<128x128xbf16, #tpu.memory_space<vmem>>, vector<128x128xbf16>
    %cst_14 = arith.constant dense<0.000000e+00> : vector<8x128xf32>
    %18 = tpu.matmul %16, %17, %cst_14 {dimension_numbers = #tpu.dot_dimension_numbers<[1], [0], [0], [1], [0, 0, 1, 1], [], []>} : vector<8x128xbf16>, vector<128x128xbf16>, vector<8x128xf32> -> vector<8x128xf32>
    %c0_15 = arith.constant 0 : index
    %c0_16 = arith.constant 0 : index
    %19 = vector.load %arg7[%c0_15, %c0_16] : memref<1x128xf32, #tpu.memory_space<vmem>>, vector<1x128xf32>
    %20 = vector.broadcast %19 : vector<1x128xf32> to vector<8x128xf32>
    %21 = arith.addf %18, %20 : vector<8x128xf32>
    %22 = arith.truncf %21 : vector<8x128xf32> to vector<8x128xbf16>
    %c0_17 = arith.constant 0 : index
    %c0_18 = arith.constant 0 : index
    %23 = vector.load %arg8[%c0_17, %c0_18] : memref<8x128xbf16, #tpu.memory_space<vmem>>, vector<8x128xbf16>
    tpu.vector_store %arg8[%c0_17, %c0_18], %22 {strides = array<i32>} : memref<8x128xbf16, #tpu.memory_space<vmem>>, vector<8x128xbf16>,
    return
  }
  func.func @transform_0(%arg0: i32) -> (i32, i32) {
    %c0_i32 = arith.constant 0 : i32
    %c0_i32_0 = arith.constant 0 : i32
    return %arg0, %c0_i32 : i32, i32
  }
  func.func @transform_1(%arg0: i32) -> (i32, i32) {
    %c0_i32 = arith.constant 0 : i32
    %c0_i32_0 = arith.constant 0 : i32
    %c0_i32_1 = arith.constant 0 : i32
    return %c0_i32, %c0_i32_0 : i32, i32
  }
  func.func @transform_2(%arg0: i32) -> (i32, i32) {
    %c0_i32 = arith.constant 0 : i32
    %c0_i32_0 = arith.constant 0 : i32
    %c0_i32_1 = arith.constant 0 : i32
    return %c0_i32, %c0_i32_0 : i32, i32
  }
  func.func @transform_3(%arg0: i32) -> (i32, i32) {
    %c0_i32 = arith.constant 0 : i32
    %c0_i32_0 = arith.constant 0 : i32
    %c0_i32_1 = arith.constant 0 : i32
    return %c0_i32, %c0_i32_0 : i32, i32
  }
  func.func @transform_4(%arg0: i32) -> (i32, i32) {
    %c0_i32 = arith.constant 0 : i32
    %c0_i32_0 = arith.constant 0 : i32
    %c0_i32_1 = arith.constant 0 : i32
    return %c0_i32, %c0_i32_0 : i32, i32
  }
  func.func @transform_5(%arg0: i32) -> (i32, i32) {
    %c0_i32 = arith.constant 0 : i32
    %c0_i32_0 = arith.constant 0 : i32
    %c0_i32_1 = arith.constant 0 : i32
    return %c0_i32, %c0_i32_0 : i32, i32
  }
  func.func @transform_6(%arg0: i32) -> (i32, i32) {
    %c0_i32 = arith.constant 0 : i32
    %c0_i32_0 = arith.constant 0 : i32
    %c0_i32_1 = arith.constant 0 : i32
    return %c0_i32, %c0_i32_0 : i32, i32
  }
  func.func @transform_7(%arg0: i32) -> (i32, i32) {
    %c0_i32 = arith.constant 0 : i32
    %c0_i32_0 = arith.constant 0 : i32
    return %arg0, %c0_i32 : i32, i32
  }
}

</mosaic_0001>

<bundles_post_ra>
// kernel: tpu_custom_call.1
= control target key start
LH: loop header
LB: loop body
LE: loop exit
PB: predicated region body
PF: predicated region fallthrough
CT: control target
= control target key end

     0   :  { %12 = vsyncpa [#allocation3], 0  ;;  %s860_s0 = inlined_call_operand.hbm [shape: bf16[8,128], index: 0, kind: input, shape index: {}]   ;;  %s861_s1 = inlined_call_operand.hbm [shape: bf16[128,128], index: 1, kind: input, shape index: {}]   ;;  %s862_s2 = inlined_call_operand.vmem [shape: f32[1,128], index: 2, kind: input, shape index: {}]   ;;  %s863_s3 = inlined_call_operand.hbm [shape: bf16[128,128], index: 3, kind: input, shape index: {}]   ;;  %s864_s4 = inlined_call_operand.vmem [shape: f32[1,128], index: 4, kind: input, shape index: {}]   ;;  %s865_s5 = inlined_call_operand.hbm [shape: bf16[128,128], index: 5, kind: input, shape index: {}]   ;;  %s866_s6 = inlined_call_operand.vmem [shape: f32[1,128], index: 6, kind: input, shape index: {}]   ;;  %s867_s7 = inlined_call_operand.hbm [shape: bf16[8,128], index: 7, kind: output, shape index: {}]  }
   0x1   :  { %13 = vsyncpa [#allocation6], 0 }
   0x2   :  { %14 = vsyncpa [#allocation9], 0 }
   0x3   :  { %15 = vsyncpa [#allocation4], 0  ;;  %s703_s24 = smov [#allocation5]   ;;  %s585_s28 = scalar_lea.hbm %s861_s1, 1024 }
   0x4   :  { %s31_s25 = sshll.u32 %s703_s24, 4  ;;  %p586_p0 = scmp.ne.s32.totalorder %s861_s1, %s585_s28  ;;  %s32_s25 = int_to_ptr.vmem [resolvable:$true] %s31_s25 }
   0x5   :  { %p589_p1 = scmp.lt.u32.totalorder %s585_s28, %s861_s1 }
   0x7   :  { %p591_p2 = pnand %p589_p1, %p586_p0 }
   0x9   :  { %594 = shalt.err (!%p591_p2)
}
   0xa   :  { %s595_s10 = scalar_lea.vmem %s32_s25, 1024  ;;  %p600_p4 = scmp.lt.s32.totalorder %s32_s25, %s32_s25 }
   0xb   :  { %p596_p3 = scmp.ne.s32.totalorder %s32_s25, %s595_s10  ;;  %p601_p5 = scmp.lt.s32.totalorder %s595_s10, %s595_s10 }
   0xd   :  { %p602_p6 = por %p601_p5, %p600_p4 }
   0xf   :  { %p603_p7 = pnand %p602_p6, %p596_p3 }
  0x11   :  { %606 = shalt.err (!%p603_p7)
}
  0x12   :  { %s704_s11 = smov 64   ;;  %s705_s12 = smov 4  }
  0x13   :  { %37 = dma.hbm_to_vmem [thread:$0]  %s861_s1, 1024, %s32_s25, [#allocation6], %s704_s11, %s704_s11, %s705_s12  }
  0x14   :  { %s706_s15 = smov [#allocation2]   ;;  %s707_s17 = smov [#allocation7]  }
  0x15   :  { %s22_s16 = sshll.u32 %s706_s15, 4  ;;  %s45_s18 = sshll.u32 %s707_s17, 4  ;;  %s23_s16 = int_to_ptr.vmem [resolvable:$true] %s22_s16  ;;  %s46_s18 = int_to_ptr.vmem [resolvable:$true] %s45_s18 }
  0x16   :  { %s607_s21 = scalar_lea.hbm %s860_s0, 64 }
  0x17   :  { %p608_p8 = scmp.ne.s32.totalorder %s860_s0, %s607_s21  ;;  %p611_p9 = scmp.lt.u32.totalorder %s607_s21, %s860_s0 }
  0x19   :  { %p613_p10 = pnand %p611_p9, %p608_p8 }
  0x1b   :  { %616 = shalt.err (!%p613_p10)
}
  0x1c   :  { %s617_s1 = scalar_lea.vmem %s23_s16, 64  ;;  %p622_p12 = scmp.lt.s32.totalorder %s23_s16, %s23_s16 }
  0x1d   :  { %p618_p11 = scmp.ne.s32.totalorder %s23_s16, %s617_s1  ;;  %p623_p13 = scmp.lt.s32.totalorder %s617_s1, %s617_s1 }
  0x1f   :  { %p624_p0 = por %p623_p13, %p622_p12 }
  0x21   :  { %p625_p1 = pnand %p624_p0, %p618_p11 }
  0x23   :  { %628 = shalt.err (!%p625_p1)
}
  0x24   :  { %25 = dma.hbm_to_vmem [thread:$0]  %s860_s0, 64, %s23_s16, [#allocation3]  }
  0x25   :  { %s629_s30 = scalar_lea.hbm %s863_s3, 1024 }
  0x26   :  { %p630_p2 = scmp.ne.s32.totalorder %s863_s3, %s629_s30  ;;  %p633_p3 = scmp.lt.u32.totalorder %s629_s30, %s863_s3 }
  0x28   :  { %p635_p4 = pnand %p633_p3, %p630_p2 }
  0x2a   :  { %638 = shalt.err (!%p635_p4)
}
  0x2b   :  { %s639_s14 = scalar_lea.vmem %s46_s18, 1024  ;;  %p644_p6 = scmp.lt.s32.totalorder %s46_s18, %s46_s18 }
  0x2c   :  { %p640_p5 = scmp.ne.s32.totalorder %s46_s18, %s639_s14  ;;  %p645_p7 = scmp.lt.s32.totalorder %s639_s14, %s639_s14 }
  0x2e   :  { %p646_p8 = por %p645_p7, %p644_p6 }
  0x30   :  { %p647_p9 = pnand %p646_p8, %p640_p5 }
  0x32   :  { %650 = shalt.err (!%p647_p9)
}
  0x33   :  { %51 = dma.hbm_to_vmem [thread:$0]  %s863_s3, 1024, %s46_s18, [#allocation6], %s704_s11, %s704_s11, %s705_s12  }
  0x34   :  { %s708_s16 = smov [#allocation8]   ;;  %s651_s21 = scalar_lea.hbm %s865_s5, 1024 }
  0x35   :  { %s59_s17 = sshll.u32 %s708_s16, 4  ;;  %p652_p10 = scmp.ne.s32.totalorder %s865_s5, %s651_s21  ;;  %s60_s17 = int_to_ptr.vmem [resolvable:$true] %s59_s17 }
  0x36   :  { %p655_p11 = scmp.lt.u32.totalorder %s651_s21, %s865_s5 }
  0x38   :  { %p657_p12 = pnand %p655_p11, %p652_p10 }
  0x3a   :  { %660 = shalt.err (!%p657_p12)
}
  0x3b   :  { %s661_s1 = scalar_lea.vmem %s60_s17, 1024  ;;  %p666_p0 = scmp.lt.s32.totalorder %s60_s17, %s60_s17 }
  0x3c   :  { %p662_p13 = scmp.ne.s32.totalorder %s60_s17, %s661_s1  ;;  %p667_p1 = scmp.lt.s32.totalorder %s661_s1, %s661_s1 }
  0x3e   :  { %p668_p2 = por %p667_p1, %p666_p0 }
  0x40   :  { %p669_p3 = pnand %p668_p2, %p662_p13 }
  0x42   :  { %672 = shalt.err (!%p669_p3)
}
  0x43   :  { %65 = dma.hbm_to_vmem [thread:$0]  %s865_s5, 1024, %s60_s17, [#allocation9], %s704_s11, %s704_s11, %s705_s12  }
  0x44   :  { %695 = dma.done.wait [#allocation3], 64  }
  0x45   :  { %696 = vsyncadd [#allocation3], 4294967232 }
  0x46   :  { %697 = dma.done.wait [#allocation6], 2048  }
  0x47   :  { %698 = vsyncadd [#allocation6], 4294965248 }
  0x48   :  { %699 = dma.done.wait [#allocation9], 1024  }
  0x49   :  { %700 = vsyncadd [#allocation9], 4294966272  ;;  %v709_v0 = vmov 0.0   ;;  %vm710_vm0 = vmmov 0   ;;  %v561_v1 = vld [vmem:[#allocation5] sm:$0xff]   ;;  %v562_v2 = vld [vmem:[#allocation5 + $0x8] sm:$0xff]  }
  0x4a   :  { %492 = vmatprep.subr.bf16.mxu0 %v709_v0  ;;  %508 = vmatprep.mubr.msk.bf16.mxu0 %vm710_vm0, %v709_v0  ;;  %v563_v3 = vld [vmem:[#allocation5 + $0x10] sm:$0xff]   ;;  %v569_v4 = vld [vmem:[#allocation7] sm:$0xff]   ;;  %v564_v5 = vld [vmem:[#allocation5 + $0x18] sm:$0xff]   ;;  %s711_s28 = smov [#allocation10]  }
  0x4b   :  { %512 = vmatprep.subr.bf16.mxu1 %v709_v0  ;;  %528 = vmatprep.mubr.msk.bf16.mxu1 %vm710_vm0, %v709_v0  ;;  %v570_v6 = vld [vmem:[#allocation7 + $0x8] sm:$0xff]   ;;  %v565_v7 = vld [vmem:[#allocation5 + $0x20] sm:$0xff]   ;;  %v571_v8 = vld [vmem:[#allocation7 + $0x10] sm:$0xff]   ;;  %s427_s29 = sshll.u32 %s711_s28, 4  ;;  %s428_s29 = int_to_ptr.vmem [resolvable:$true] %s427_s29 }
  0x4c   :  { %493 = vmatpush3.bf16.msra.mxu0 %v561_v1  ;;  %513 = vmatpush3.bf16.msra.mxu1 %v569_v4  ;;  %v566_v9 = vld [vmem:[#allocation5 + $0x28] sm:$0xff]   ;;  %v572_v10 = vld [vmem:[#allocation7 + $0x18] sm:$0xff]   ;;  %v567_v11 = vld [vmem:[#allocation5 + $0x30] sm:$0xff]   ;;  %p678_p5 = scmp.lt.s32.totalorder %s428_s29, %s428_s29 }
  0x4d   :  { %494 = vmatprep.subr.bf16.mxu0 %v709_v0  ;;  %514 = vmatprep.subr.bf16.mxu1 %v709_v0  ;;  %v573_v12 = vld [vmem:[#allocation7 + $0x20] sm:$0xff]   ;;  %v568_v13 = vld [vmem:[#allocation5 + $0x38] sm:$0xff]   ;;  %v574_v14 = vld [vmem:[#allocation7 + $0x28] sm:$0xff]  }
  0x4e   :  { %v81_v15 = vld [vmem:[#allocation2] sm:$0xf]  ;;  %v575_v16 = vld [vmem:[#allocation7 + $0x30] sm:$0xff]   ;;  %v577_v18 = vld [vmem:[#allocation8] sm:$0xff]  }
  0x4f   :  { %v576_v17 = vld [vmem:[#allocation7 + $0x38] sm:$0xff]   ;;  %v578_v19 = vld [vmem:[#allocation8 + $0x8] sm:$0xff]   ;;  %v579_v20 = vld [vmem:[#allocation8 + $0x10] sm:$0xff]  }
  0x50   :  { %495 = vmatpush3.bf16.msra.mxu0 %v562_v2  ;;  %515 = vmatpush3.bf16.msra.mxu1 %v570_v6  ;;  %v580_v21 = vld [vmem:[#allocation8 + $0x18] sm:$0xff]   ;;  %v581_v22 = vld [vmem:[#allocation8 + $0x20] sm:$0xff]   ;;  %v582_v23 = vld [vmem:[#allocation8 + $0x28] sm:$0xff]  }
  0x51   :  { %496 = vmatprep.subr.bf16.mxu0 %v709_v0  ;;  %516 = vmatprep.subr.bf16.mxu1 %v709_v0  ;;  %v438_v24 = vld [vmem:[%s862_s2] ss:$0 sm:$0xff]  ;;  %v583_v32 = vld [vmem:[#allocation8 + $0x30] sm:$0xff]  }
  0x52   :  { %v584_v33 = vld [vmem:[#allocation8 + $0x38] sm:$0xff]  }
  0x53   :  { %v447_v34 = vld [vmem:[%s864_s4] ss:$0 sm:$0xff]  ;;  %s673_s4 = scalar_lea.vmem %s428_s29, 64 }
  0x54   :  { %497 = vmatpush3.bf16.msra.mxu0 %v563_v3  ;;  %517 = vmatpush3.bf16.msra.mxu1 %v571_v8  ;;  %v456_v42 = vld [vmem:[%s866_s6] ss:$0 sm:$0xff]  ;;  %p674_p4 = scmp.ne.s32.totalorder %s428_s29, %s673_s4  ;;  %p679_p6 = scmp.lt.s32.totalorder %s673_s4, %s673_s4 }
  0x55   :  { %498 = vmatprep.subr.bf16.mxu0 %v709_v0  ;;  %518 = vmatprep.subr.bf16.mxu1 %v709_v0 }
  0x56   :  { %p680_p7 = por %p679_p6, %p678_p5 }
  0x58   :  { %499 = vmatpush3.bf16.msra.mxu0 %v564_v5  ;;  %519 = vmatpush3.bf16.msra.mxu1 %v572_v10  ;;  %p681_p8 = pnand %p680_p7, %p674_p4 }
  0x59   :  { %500 = vmatprep.subr.bf16.mxu0 %v709_v0  ;;  %520 = vmatprep.subr.bf16.mxu1 %v709_v0 }
  0x5c   :  { %501 = vmatpush3.bf16.msra.mxu0 %v565_v7  ;;  %521 = vmatpush3.bf16.msra.mxu1 %v573_v12 }
  0x5d   :  { %502 = vmatprep.subr.bf16.mxu0 %v709_v0  ;;  %522 = vmatprep.subr.bf16.mxu1 %v709_v0 }
  0x60   :  { %503 = vmatpush3.bf16.msra.mxu0 %v566_v9  ;;  %523 = vmatpush3.bf16.msra.mxu1 %v574_v14 }
  0x61   :  { %504 = vmatprep.subr.bf16.mxu0 %v709_v0  ;;  %524 = vmatprep.subr.bf16.mxu1 %v709_v0 }
  0x64   :  { %505 = vmatpush3.bf16.msra.mxu0 %v567_v11  ;;  %525 = vmatpush3.bf16.msra.mxu1 %v575_v16 }
  0x65   :  { %506 = vmatprep.subr.bf16.mxu0 %v709_v0  ;;  %526 = vmatprep.subr.bf16.mxu1 %v709_v0 }
  0x68   :  { %507 = vmatpush3.bf16.msra.mxu0 %v568_v13  ;;  %527 = vmatpush3.bf16.msra.mxu1 %v576_v17 }
  0x69   :  { %532 = vmatprep.subr.bf16.mxu0 %v709_v0 }
  0x6b   :  { %509 = vmatmul.mubr.bf16.vlgmr.msra.gmra.mrb[0].mxu0 %v81_v15 }
  0x6c   :  { %548 = vmatprep.mubr.msk.bf16.mxu0 %vm710_vm0, %v709_v0  ;;  %533 = vmatpush3.bf16.msra.mxu0 %v577_v18 }
  0x6d   :  { %534 = vmatprep.subr.bf16.mxu0 %v709_v0 }
  0x70   :  { %535 = vmatpush3.bf16.msra.mxu0 %v578_v19 }
  0x71   :  { %536 = vmatprep.subr.bf16.mxu0 %v709_v0 }
  0x74   :  { %537 = vmatpush3.bf16.msra.mxu0 %v579_v20 }
  0x75   :  { %538 = vmatprep.subr.bf16.mxu0 %v709_v0 }
  0x78   :  { %539 = vmatpush3.bf16.msra.mxu0 %v580_v21 }
  0x79   :  { %540 = vmatprep.subr.bf16.mxu0 %v709_v0 }
  0x7c   :  { %541 = vmatpush3.bf16.msra.mxu0 %v581_v22 }
  0x7d   :  { %542 = vmatprep.subr.bf16.mxu0 %v709_v0 }
  0x80   :  { %543 = vmatpush3.bf16.msra.mxu0 %v582_v23 }
  0x81   :  { %544 = vmatprep.subr.bf16.mxu0 %v709_v0 }
  0x84   :  { %545 = vmatpush3.bf16.msra.mxu0 %v583_v32 }
  0x85   :  { %546 = vmatprep.subr.bf16.mxu0 %v709_v0 }
  0x88   :  { %547 = vmatpush3.bf16.msra.mxu0 %v584_v33 }
 0x13e   :  { %v187_v25 = vpop.f32.mrb[0].mxu0 }
 0x13f   :  { %v188_v26 = vadd.f32 %v438_v24, %v187_v25  ;;  %v510_v27 = vpop.f32.mrb[1].mxu0 }
 0x140   :  { %v190_v28 = vpop.f32.mrb[2].mxu0 }
 0x141   :  { %v193_v29 = vmax.f32 %v188_v26, 0.0  ;;  %v511_v30 = vpop.f32.mrb[3].mxu0 }
 0x143   :  { %v194_v31 = vpack.c.bf16 %v193_v29, %v193_v29 }
 0x145   :  { %529 = vmatmul.mubr.bf16.vlgmr.msra.gmra.mrb[0].mxu1 %v194_v31 }
 0x218   :  { %v300_v35 = vpop.f32.mrb[0].mxu1 }
 0x219   :  { %v301_v36 = vadd.f32 %v447_v34, %v300_v35  ;;  %v530_v37 = vpop.f32.mrb[1].mxu1 }
 0x21a   :  { %v303_v38 = vpop.f32.mrb[2].mxu1 }
 0x21b   :  { %v306_v39 = vmax.f32 %v301_v36, 0.0  ;;  %v531_v40 = vpop.f32.mrb[3].mxu1 }
 0x21d   :  { %v307_v41 = vpack.c.bf16 %v306_v39, %v306_v39 }
 0x21f   :  { %549 = vmatmul.mubr.bf16.vlgmr.msra.gmra.mrb[4].mxu0 %v307_v41 }
 0x2f2   :  { %v413_v43 = vpop.f32.mrb[4].mxu0 }
 0x2f3   :  { %v414_v44 = vadd.f32 %v456_v42, %v413_v43  ;;  %v550_v45 = vpop.f32.mrb[5].mxu0 }
 0x2f4   :  { %v416_v46 = vpop.f32.mrb[6].mxu0 }
 0x2f5   :  { %v419_v47 = vpack.c.bf16 %v414_v44, %v414_v44  ;;  %v551_v48 = vpop.f32.mrb[7].mxu0 }
 0x2f7   :  { %420 = vst [vmem:[#allocation10] sm:$0xf] %v419_v47 }
 0x2f8   :  { %684 = shalt.err (!%p681_p8)
}
 0x2f9   :  { %s685_s6 = scalar_lea.hbm %s867_s7, 64 }
 0x2fa   :  { %p686_p9 = scmp.ne.s32.totalorder %s867_s7, %s685_s6  ;;  %p689_p10 = scmp.lt.u32.totalorder %s685_s6, %s867_s7 }
 0x2fc   :  { %p691_p11 = pnand %p689_p10, %p686_p9 }
 0x2fe   :  { %694 = shalt.err (!%p691_p11)
}
 0x2ff   :  { %430 = dma.vmem_to_hbm [thread:$0]  %s428_s29, 64, %s867_s7, [#allocation4]  }
 0x300   :  { %701 = dma.done.wait [#allocation4], 64  }
 0x301   :  { %702 = vsyncadd [#allocation4], 4294967232 }
 0x302   :  { %434 = vsyncpa [#allocation3], 1 }
 0x303   :  { %435 = vsyncpa [#allocation6], 1 }
 0x304   :  { %436 = vsyncpa [#allocation9], 1 }
 0x305   :  { %437 = vsyncpa [#allocation4], 1 }

</bundles_post_ra>
